<compile_context>
chip_gen: v7x
topology: tpu7x:2x2x1
jax: 0.10.0
libtpu: 0.0.40
codegen_flags: <defaults>
</compile_context>

<pallas_src>
import functools

import jax
import jax.numpy as jnp
from jax.experimental import pallas as pl
from jax.experimental.pallas import tpu as pltpu

EPS = 1e-5    # nn.LayerNorm default
_LANE = 128   # TPU lane width


def _silu(x):
    return x * jax.nn.sigmoid(x)


def _round_up(n, m):
    return ((n + m - 1) // m) * m


def _pad_axis(a, axis, new_size):
    pad = new_size - a.shape[axis]
    if pad == 0:
        return a
    widths = [(0, 0)] * a.ndim
    widths[axis] = (0, pad)
    return jnp.pad(a, widths)   # zero padding (required for padded-lane math)


def tinyrf_kernel(
    xt_ref,                      # [Bt, Cin+1]  f32   (x | t), batch tile
    w_in_ref, b_in_ref,          # [Cin+1, 2Hp] wdt / [1, 2Hp] f32  fused prologue
    wmod_ref, bmod_ref,          # [Hp, 2Hp]    wdt / [1, 2Hp] f32  layer l (shift|scale)
    gamma_ref, beta_ref,         # [1, Hp] f32                      layer l LayerNorm affine
    wff_ref, bff_ref,            # [Hp, Hp]     wdt / [1, Hp]  f32  layer l ff
    wlast_ref, blast_ref,        # [Hp, CoutP]  wdt / [1, CoutP] f32
    out_ref,                     # [Bt, CoutP] f32
    h_sc, tact_sc,               # VMEM scratch [Bt, Hp] f32 (persist across l)
    *, h_real,
):
    hp = h_sc.shape[1]
    wdt = wff_ref.dtype
    l = pl.program_id(1)

    @pl.when(l == 0)
    def _prologue():
        # Fused prologue: [x | t] @ [[Wi, 0], [0, Wt]] = [x@Wi | t*Wt], + [bi | bt].
        pre = jnp.dot(xt_ref[...].astype(wdt), w_in_ref[...],
                      preferred_element_type=jnp.float32) + b_in_ref[...]
        h_sc[...] = pre[:, :hp]            # input embed (padded lanes exactly 0)
        tact_sc[...] = _silu(pre[:, hp:])  # SiLU(timestep embed), reused by every layer

    h = h_sc[...]

    # LayerNorm over the real H only.  Padded lanes of h are exactly 0, so the
    # full-width lane sums are usable; variance uses the two-pass form with the
    # exact padded-lane correction (each padded lane contributes mu^2 to sum(d*d)).
    inv_h = 1.0 / float(h_real)
    mu = jnp.sum(h, axis=-1, keepdims=True) * inv_h
    d = h - mu
    ssq = jnp.sum(d * d, axis=-1, keepdims=True) - float(hp - h_real) * (mu * mu)
    xn = d * jax.lax.rsqrt(ssq * inv_h + EPS)
    xn = xn * gamma_ref[...] + beta_ref[...]        # padded lanes forced back to 0

    # This layer's shift/scale from the resident SiLU(t_emb): one lane-dense dot,
    # live range bounded to this grid step (no [B, 2*L*H] tensor held live).
    mods = jnp.dot(tact_sc[...].astype(wdt), wmod_ref[...],
                   preferred_element_type=jnp.float32) + bmod_ref[...]
    shift = mods[:, :hp]
    scale = mods[:, hp:]

    # ff(xn*(1+scale)+shift) with ff = Linear -> SiLU; rewritten to shorten the
    # VPU dependence chain.
    y = xn + xn * scale + shift
    y = jnp.dot(y.astype(wdt), wff_ref[...],
                preferred_element_type=jnp.float32) + bff_ref[...]
    h_sc[...] = h + _silu(y)               # x = x + layer(x, t); padded lanes stay 0

    @pl.when(l == pl.num_programs(1) - 1)
    def _epilogue():
        out_ref[...] = jnp.dot(h_sc[...].astype(wdt), wlast_ref[...],
                               preferred_element_type=jnp.float32) + blast_ref[...]


def _pack_params(params, hp, coutp, weight_dtype):
    """Zero-pad feature axes, fuse shift|scale weights per layer, build the
    block prologue weight, cast matmul weights to weight_dtype."""
    cin = params["wi"].shape[0]

    # Block prologue weight [[Wi, 0], [0, Wt]] : [Cin+1, 2*Hp]
    wi = _pad_axis(params["wi"], 1, hp)                        # [Cin, Hp]
    wt = _pad_axis(params["wt"], 1, hp)                        # [1, Hp]
    w_in = jnp.concatenate(
        [jnp.concatenate([wi, jnp.zeros((cin, hp), jnp.float32)], axis=1),
         jnp.concatenate([jnp.zeros((1, hp), jnp.float32), wt], axis=1)],
        axis=0)                                                # [Cin+1, 2*Hp]
    b_in = jnp.concatenate([_pad_axis(params["bi"], 1, hp),
                            _pad_axis(params["bt"], 1, hp)], axis=1)

    # Per-layer fused modulation weight (shift | scale) : [L, Hp, 2*Hp]
    wsh = _pad_axis(_pad_axis(params["wshift"], 1, hp), 2, hp)
    wsc = _pad_axis(_pad_axis(params["wscale"], 1, hp), 2, hp)
    wmod = jnp.concatenate([wsh, wsc], axis=2)
    bmod = jnp.concatenate([_pad_axis(params["bshift"], 2, hp),
                            _pad_axis(params["bscale"], 2, hp)], axis=2)

    return dict(
        w_in=w_in.astype(weight_dtype), b_in=b_in,
        wmod=wmod.astype(weight_dtype), bmod=bmod,
        gamma=_pad_axis(params["gamma"], 2, hp),   # zero in padded lanes (required!)
        beta=_pad_axis(params["beta"], 2, hp),
        wff=_pad_axis(_pad_axis(params["wff"], 1, hp), 2, hp).astype(weight_dtype),
        bff=_pad_axis(params["bff"], 2, hp),
        wlast=_pad_axis(_pad_axis(params["wlast"], 0, hp),
                        1, coutp).astype(weight_dtype),
        blast=_pad_axis(params["blast"], 1, coutp),
    )


def tinyrf_forward(x, t, params, *, n_layers, weight_dtype=jnp.bfloat16,
                   batch_tile=128):
    B, Cin = x.shape
    H = params["wt"].shape[1]
    Cout = params["wlast"].shape[1]

    # Lane-dense feature padding: 256-wide K/N tiles when H is large enough
    # (v6e/v7x MXUs are 2x256^2); 128 otherwise.
    lane_mult = 256 if H >= 256 else _LANE
    Hp = _round_up(H, lane_mult)
    CoutP = _round_up(Cout, _LANE)

    # Batch tiling: pad B to a sublane multiple, tile into blocks of up to
    # `batch_tile` rows so each MXU push sees a tall M when B is large.
    Bt = min(batch_tile, _round_up(B, 8))
    Bp = _round_up(B, Bt)
    n_bblk = Bp // Bt
    Cin1 = Cin + 1

    xt = _pad_axis(jnp.concatenate([x, t], axis=1).astype(jnp.float32), 0, Bp)

    pp = _pack_params(params, Hp, CoutP, weight_dtype)
    inputs = (xt, pp["w_in"], pp["b_in"], pp["wmod"], pp["bmod"],
              pp["gamma"], pp["beta"], pp["wff"], pp["bff"],
              pp["wlast"], pp["blast"])

    # Batch-tiled activations/output; per-layer weights streamed over l;
    # shared weights resident (constant index_map).
    in_specs = [
        pl.BlockSpec((Bt, Cin1), lambda b, l: (b, 0)),
        pl.BlockSpec((Cin1, 2 * Hp), lambda b, l: (0, 0)),
        pl.BlockSpec((1, 2 * Hp), lambda b, l: (0, 0)),
        pl.BlockSpec((None, Hp, 2 * Hp), lambda b, l: (l, 0, 0)),
        pl.BlockSpec((None, 1, 2 * Hp), lambda b, l: (l, 0, 0)),
        pl.BlockSpec((None, 1, Hp), lambda b, l: (l, 0, 0)),
        pl.BlockSpec((None, 1, Hp), lambda b, l: (l, 0, 0)),
        pl.BlockSpec((None, Hp, Hp), lambda b, l: (l, 0, 0)),
        pl.BlockSpec((None, 1, Hp), lambda b, l: (l, 0, 0)),
        pl.BlockSpec((Hp, CoutP), lambda b, l: (0, 0)),
        pl.BlockSpec((1, CoutP), lambda b, l: (0, 0)),
    ]
    out_spec = pl.BlockSpec((Bt, CoutP), lambda b, l: (b, 0))

    # VMEM budget from actual packed residency (+ double buffers + headroom).
    wbytes = jnp.dtype(weight_dtype).itemsize
    f32b = 4
    resident = (Bt * Cin1 * f32b + Bt * CoutP * f32b            # xt / out blocks
                + (Cin1 * 2 * Hp + Hp * CoutP) * wbytes         # w_in + wlast
                + (2 * Hp + CoutP) * f32b)                      # b_in + blast
    per_layer = ((Hp * 2 * Hp + Hp * Hp) * wbytes               # wmod + wff
                 + 5 * Hp * f32b)                               # bmod + gamma + beta + bff
    scratch_bytes = 2 * Bt * Hp * f32b
    vmem_limit = int(min(max(2 * resident + 2 * per_layer + scratch_bytes + (8 << 20),
                             32 << 20), 100 << 20))

    # Advisory cost estimate (matmuls only; elementwise/LayerNorm omitted).
    flops = 2 * Bp * (n_layers * 3 * Hp * Hp + Cin1 * 2 * Hp + Hp * CoutP)
    transcendentals = Bp * Hp * (n_layers + 1)
    bytes_accessed = (sum(int(a.size) * a.dtype.itemsize for a in inputs)
                      + Bp * CoutP * 4)

    out_pad = pl.pallas_call(
        functools.partial(tinyrf_kernel, h_real=H),
        out_shape=jax.ShapeDtypeStruct((Bp, CoutP), jnp.float32),
        grid=(n_bblk, n_layers),
        in_specs=in_specs,
        out_specs=out_spec,
        scratch_shapes=[pltpu.VMEM((Bt, Hp), jnp.float32),   # residual stream h
                        pltpu.VMEM((Bt, Hp), jnp.float32)],  # SiLU(t_emb)
        compiler_params=pltpu.CompilerParams(
            dimension_semantics=("parallel", "arbitrary"),
            vmem_limit_bytes=vmem_limit),
        cost_estimate=pl.CostEstimate(flops=flops,
                                      transcendentals=transcendentals,
                                      bytes_accessed=bytes_accessed),
    )(*inputs)
    # Slice off batch / lane padding.
    return out_pad[:B, :Cout]


def tinyrf_reference(x, t, params, *, n_layers):
    """Pure-JAX reference mirroring the PyTorch forward (unpadded, f32)."""
    t_emb = t * params["wt"] + params["bt"]
    h = x @ params["wi"] + params["bi"]
    t_act = _silu(t_emb)
    for l in range(n_layers):
        mu = jnp.mean(h, axis=-1, keepdims=True)
        var = jnp.mean((h - mu) ** 2, axis=-1, keepdims=True)
        xn = (h - mu) / jnp.sqrt(var + EPS)
        xn = xn * params["gamma"][l] + params["beta"][l]
        shift = t_act @ params["wshift"][l] + params["bshift"][l]
        scale = t_act @ params["wscale"][l] + params["bscale"][l]
        y = _silu((xn * (1.0 + scale) + shift) @ params["wff"][l] + params["bff"][l])
        h = h + y
    return h @ params["wlast"] + params["blast"]


if __name__ == "__main__":
    B, Cin, H, Cout, L = 8, 4, 32, 4, 2

    key = jax.random.PRNGKey(0)
    ks = jax.random.split(key, 14)

    def rnd(k, shape, scale=0.1):
        return jax.random.normal(k, shape, dtype=jnp.float32) * scale

    params = dict(
        wt=rnd(ks[0], (1, H)),        bt=rnd(ks[1], (1, H)),
        wi=rnd(ks[2], (Cin, H)),      bi=rnd(ks[3], (1, H)),
        wff=rnd(ks[4], (L, H, H)),    bff=rnd(ks[5], (L, 1, H)),
        wshift=rnd(ks[6], (L, H, H)), bshift=rnd(ks[7], (L, 1, H)),
        wscale=rnd(ks[8], (L, H, H)), bscale=rnd(ks[9], (L, 1, H)),
        gamma=jnp.ones((L, 1, H), jnp.float32),
        beta=jnp.zeros((L, 1, H), jnp.float32),
        wlast=rnd(ks[10], (H, Cout)), blast=rnd(ks[11], (1, Cout)),
    )

    x = jax.random.normal(ks[12], (B, Cin), dtype=jnp.float32)
    t = jax.nn.sigmoid(jax.random.normal(ks[13], (B, 1), dtype=jnp.float32))

    ref = tinyrf_reference(x, t, params, n_layers=L)

    # f32 weight path: strict numerics check.
    out_f32 = jax.block_until_ready(
        tinyrf_forward(x, t, params, n_layers=L, weight_dtype=jnp.float32))
    assert out_f32.shape == (B, Cout), out_f32.shape
    assert jnp.allclose(out_f32, ref, atol=1e-4, rtol=1e-4), \
        jnp.max(jnp.abs(out_f32 - ref))

    # Default bf16 weight path (halved weight VMEM/HBM traffic): loose check vs f32 ref.
    out_bf16 = jax.block_until_ready(tinyrf_forward(x, t, params, n_layers=L))
    assert out_bf16.shape == (B, Cout), out_bf16.shape
    assert jnp.allclose(out_bf16, ref, atol=2e-2, rtol=2e-2), \
        jnp.max(jnp.abs(out_bf16 - ref))

    print("KERNEL_OK")
</pallas_src>

<mosaic_0001>
module attributes {stable_mosaic.version = 11 : i64} {
  func.func @tinyrf_kernel(%arg0: i32, %arg1: i32, %arg2: memref<8x5xf32, #tpu.memory_space<vmem>>, %arg3: memref<5x256xf32, #tpu.memory_space<vmem>>, %arg4: memref<1x256xf32, #tpu.memory_space<vmem>>, %arg5: memref<1x128x256xf32, #tpu.memory_space<vmem>>, %arg6: memref<1x1x256xf32, #tpu.memory_space<vmem>>, %arg7: memref<1x1x128xf32, #tpu.memory_space<vmem>>, %arg8: memref<1x1x128xf32, #tpu.memory_space<vmem>>, %arg9: memref<1x128x128xf32, #tpu.memory_space<vmem>>, %arg10: memref<1x1x128xf32, #tpu.memory_space<vmem>>, %arg11: memref<128x128xf32, #tpu.memory_space<vmem>>, %arg12: memref<1x128xf32, #tpu.memory_space<vmem>>, %arg13: memref<8x128xf32, #tpu.memory_space<vmem>>, %arg14: memref<8x128xf32, #tpu.memory_space<vmem>>, %arg15: memref<8x128xf32, #tpu.memory_space<vmem>>) attributes {dimension_semantics = [#tpu.dimension_semantics<parallel>, #tpu.dimension_semantics<arbitrary>], iteration_bounds = array<i64: 1, 2>, scalar_prefetch = 0 : i64, scratch_operands = 2 : i64, tpu.core_type = #tpu.core_type<tc>, window_params = [{transform_indices = @transform_0, window_bounds = array<i64: 8, 5>}, {pipeline_mode = #tpu.pipeline_mode<synchronous>, transform_indices = @transform_1, window_bounds = array<i64: 5, 256>}, {pipeline_mode = #tpu.pipeline_mode<synchronous>, transform_indices = @transform_2, window_bounds = array<i64: 1, 256>}, {transform_indices = @transform_3, window_bounds = array<i64: 1, 128, 256>}, {transform_indices = @transform_4, window_bounds = array<i64: 1, 1, 256>}, {transform_indices = @transform_5, window_bounds = array<i64: 1, 1, 128>}, {transform_indices = @transform_6, window_bounds = array<i64: 1, 1, 128>}, {transform_indices = @transform_7, window_bounds = array<i64: 1, 128, 128>}, {transform_indices = @transform_8, window_bounds = array<i64: 1, 1, 128>}, {pipeline_mode = #tpu.pipeline_mode<synchronous>, transform_indices = @transform_9, window_bounds = array<i64: 128, 128>}, {pipeline_mode = #tpu.pipeline_mode<synchronous>, transform_indices = @transform_10, window_bounds = array<i64: 1, 128>}, {transform_indices = @transform_11, window_bounds = array<i64: 8, 128>}]} {
    %c0_i32 = arith.constant 0 : i32
    %0 = arith.cmpi eq, %arg1, %c0_i32 : i32
    %1 = arith.extui %0 : i1 to i32
    %c0_i32_0 = arith.constant 0 : i32
    %2 = arith.cmpi ne, %1, %c0_i32_0 : i32
    scf.if %2 {
      %c0_33 = arith.constant 0 : index
      %c0_34 = arith.constant 0 : index
      %63 = vector.load %arg2[%c0_33, %c0_34] : memref<8x5xf32, #tpu.memory_space<vmem>>, vector<8x5xf32>
      %c0_35 = arith.constant 0 : index
      %c0_36 = arith.constant 0 : index
      %64 = vector.load %arg3[%c0_35, %c0_36] : memref<5x256xf32, #tpu.memory_space<vmem>>, vector<5x256xf32>
      %cst_37 = arith.constant dense<0.000000e+00> : vector<8x256xf32>
      %65 = tpu.matmul %63, %64, %cst_37 {dimension_numbers = #tpu.dot_dimension_numbers<[1], [0], [0], [1], [0, 0, 1, 1], [], []>} : vector<8x5xf32>, vector<5x256xf32>, vector<8x256xf32> -> vector<8x256xf32>
      %c0_38 = arith.constant 0 : index
      %c0_39 = arith.constant 0 : index
      %66 = vector.load %arg4[%c0_38, %c0_39] : memref<1x256xf32, #tpu.memory_space<vmem>>, vector<1x256xf32>
      %67 = vector.broadcast %66 : vector<1x256xf32> to vector<8x256xf32>
      %68 = arith.addf %65, %67 : vector<8x256xf32>
      %69 = vector.extract_strided_slice %68 {offsets = [0, 0], sizes = [8, 128], strides = [1, 1]} : vector<8x256xf32> to vector<8x128xf32>
      %c0_40 = arith.constant 0 : index
      %c0_41 = arith.constant 0 : index
      %70 = vector.load %arg14[%c0_40, %c0_41] : memref<8x128xf32, #tpu.memory_space<vmem>>, vector<8x128xf32>
      tpu.vector_store %arg14[%c0_40, %c0_41], %69 {strides = array<i32>} : memref<8x128xf32, #tpu.memory_space<vmem>>, vector<8x128xf32>,
      %71 = vector.extract_strided_slice %68 {offsets = [0, 128], sizes = [8, 128], strides = [1, 1]} : vector<8x256xf32> to vector<8x128xf32>
      %72 = arith.negf %71 : vector<8x128xf32>
      %73 = math.exp %72 : vector<8x128xf32>
      %cst_42 = arith.constant 1.000000e+00 : f32
      %74 = vector.broadcast %cst_42 : f32 to vector<8x128xf32>
      %75 = arith.addf %74, %73 : vector<8x128xf32>
      %76 = arith.divf %74, %75 : vector<8x128xf32>
      %77 = arith.mulf %71, %76 : vector<8x128xf32>
      %c0_43 = arith.constant 0 : index
      %c0_44 = arith.constant 0 : index
      %78 = vector.load %arg15[%c0_43, %c0_44] : memref<8x128xf32, #tpu.memory_space<vmem>>, vector<8x128xf32>
      tpu.vector_store %arg15[%c0_43, %c0_44], %77 {strides = array<i32>} : memref<8x128xf32, #tpu.memory_space<vmem>>, vector<8x128xf32>,
    } else {
    }
    %c0 = arith.constant 0 : index
    %c0_1 = arith.constant 0 : index
    %3 = vector.load %arg14[%c0, %c0_1] : memref<8x128xf32, #tpu.memory_space<vmem>>, vector<8x128xf32>
    %cst = arith.constant dense<0.000000e+00> : vector<8xf32>
    %4 = vector.multi_reduction <add>, %3, %cst [1] : vector<8x128xf32> to vector<8xf32>
    %5 = vector.shape_cast %4 : vector<8xf32> to vector<8x1xf32>
    %cst_2 = arith.constant 3.125000e-02 : f32
    %6 = vector.broadcast %cst_2 : f32 to vector<8x1xf32>
    %7 = arith.mulf %5, %6 : vector<8x1xf32>
    %8 = vector.broadcast %7 : vector<8x1xf32> to vector<8x128xf32>
    %9 = arith.subf %3, %8 : vector<8x128xf32>
    %10 = arith.mulf %9, %9 : vector<8x128xf32>
    %cst_3 = arith.constant dense<0.000000e+00> : vector<8xf32>
    %11 = vector.multi_reduction <add>, %10, %cst_3 [1] : vector<8x128xf32> to vector<8xf32>
    %12 = vector.shape_cast %11 : vector<8xf32> to vector<8x1xf32>
    %13 = arith.mulf %7, %7 : vector<8x1xf32>
    %cst_4 = arith.constant 9.600000e+01 : f32
    %14 = vector.broadcast %cst_4 : f32 to vector<8x1xf32>
    %15 = arith.mulf %14, %13 : vector<8x1xf32>
    %16 = arith.subf %12, %15 : vector<8x1xf32>
    %cst_5 = arith.constant 3.125000e-02 : f32
    %17 = vector.broadcast %cst_5 : f32 to vector<8x1xf32>
    %18 = arith.mulf %16, %17 : vector<8x1xf32>
    %cst_6 = arith.constant 9.99999974E-6 : f32
    %19 = vector.broadcast %cst_6 : f32 to vector<8x1xf32>
    %20 = arith.addf %18, %19 : vector<8x1xf32>
    %21 = math.rsqrt %20 : vector<8x1xf32>
    %22 = vector.broadcast %21 : vector<8x1xf32> to vector<8x128xf32>
    %23 = arith.mulf %9, %22 : vector<8x128xf32>
    %c0_7 = arith.constant 0 : index
    %c0_8 = arith.constant 0 : index
    %c0_9 = arith.constant 0 : index
    %24 = vector.load %arg7[%c0_7, %c0_8, %c0_9] : memref<1x1x128xf32, #tpu.memory_space<vmem>>, vector<1x1x128xf32>
    %25 = vector.shape_cast %24 : vector<1x1x128xf32> to vector<1x128xf32>
    %26 = vector.broadcast %25 : vector<1x128xf32> to vector<8x128xf32>
    %27 = arith.mulf %23, %26 : vector<8x128xf32>
    %c0_10 = arith.constant 0 : index
    %c0_11 = arith.constant 0 : index
    %c0_12 = arith.constant 0 : index
    %28 = vector.load %arg8[%c0_10, %c0_11, %c0_12] : memref<1x1x128xf32, #tpu.memory_space<vmem>>, vector<1x1x128xf32>
    %29 = vector.shape_cast %28 : vector<1x1x128xf32> to vector<1x128xf32>
    %30 = vector.broadcast %29 : vector<1x128xf32> to vector<8x128xf32>
    %31 = arith.addf %27, %30 : vector<8x128xf32>
    %c0_13 = arith.constant 0 : index
    %c0_14 = arith.constant 0 : index
    %32 = vector.load %arg15[%c0_13, %c0_14] : memref<8x128xf32, #tpu.memory_space<vmem>>, vector<8x128xf32>
    %c0_15 = arith.constant 0 : index
    %c0_16 = arith.constant 0 : index
    %c0_17 = arith.constant 0 : index
    %33 = vector.load %arg5[%c0_15, %c0_16, %c0_17] : memref<1x128x256xf32, #tpu.memory_space<vmem>>, vector<1x128x256xf32>
    %34 = vector.shape_cast %33 : vector<1x128x256xf32> to vector<128x256xf32>
    %cst_18 = arith.constant dense<0.000000e+00> : vector<8x256xf32>
    %35 = tpu.matmul %32, %34, %cst_18 {dimension_numbers = #tpu.dot_dimension_numbers<[1], [0], [0], [1], [0, 0, 1, 1], [], []>} : vector<8x128xf32>, vector<128x256xf32>, vector<8x256xf32> -> vector<8x256xf32>
    %c0_19 = arith.constant 0 : index
    %c0_20 = arith.constant 0 : index
    %c0_21 = arith.constant 0 : index
    %36 = vector.load %arg6[%c0_19, %c0_20, %c0_21] : memref<1x1x256xf32, #tpu.memory_space<vmem>>, vector<1x1x256xf32>
    %37 = vector.shape_cast %36 : vector<1x1x256xf32> to vector<1x256xf32>
    %38 = vector.broadcast %37 : vector<1x256xf32> to vector<8x256xf32>
    %39 = arith.addf %35, %38 : vector<8x256xf32>
    %40 = vector.extract_strided_slice %39 {offsets = [0, 0], sizes = [8, 128], strides = [1, 1]} : vector<8x256xf32> to vector<8x128xf32>
    %41 = vector.extract_strided_slice %39 {offsets = [0, 128], sizes = [8, 128], strides = [1, 1]} : vector<8x256xf32> to vector<8x128xf32>
    %42 = arith.mulf %31, %41 : vector<8x128xf32>
    %43 = arith.addf %31, %42 : vector<8x128xf32>
    %44 = arith.addf %43, %40 : vector<8x128xf32>
    %c0_22 = arith.constant 0 : index
    %c0_23 = arith.constant 0 : index
    %c0_24 = arith.constant 0 : index
    %45 = vector.load %arg9[%c0_22, %c0_23, %c0_24] : memref<1x128x128xf32, #tpu.memory_space<vmem>>, vector<1x128x128xf32>
    %46 = vector.shape_cast %45 : vector<1x128x128xf32> to vector<128x128xf32>
    %cst_25 = arith.constant dense<0.000000e+00> : vector<8x128xf32>
    %47 = tpu.matmul %44, %46, %cst_25 {dimension_numbers = #tpu.dot_dimension_numbers<[1], [0], [0], [1], [0, 0, 1, 1], [], []>} : vector<8x128xf32>, vector<128x128xf32>, vector<8x128xf32> -> vector<8x128xf32>
    %c0_26 = arith.constant 0 : index
    %c0_27 = arith.constant 0 : index
    %c0_28 = arith.constant 0 : index
    %48 = vector.load %arg10[%c0_26, %c0_27, %c0_28] : memref<1x1x128xf32, #tpu.memory_space<vmem>>, vector<1x1x128xf32>
    %49 = vector.shape_cast %48 : vector<1x1x128xf32> to vector<1x128xf32>
    %50 = vector.broadcast %49 : vector<1x128xf32> to vector<8x128xf32>
    %51 = arith.addf %47, %50 : vector<8x128xf32>
    %52 = arith.negf %51 : vector<8x128xf32>
    %53 = math.exp %52 : vector<8x128xf32>
    %cst_29 = arith.constant 1.000000e+00 : f32
    %54 = vector.broadcast %cst_29 : f32 to vector<8x128xf32>
    %55 = arith.addf %54, %53 : vector<8x128xf32>
    %56 = arith.divf %54, %55 : vector<8x128xf32>
    %57 = arith.mulf %51, %56 : vector<8x128xf32>
    %58 = arith.addf %3, %57 : vector<8x128xf32>
    %c0_30 = arith.constant 0 : index
    %c0_31 = arith.constant 0 : index
    %59 = vector.load %arg14[%c0_30, %c0_31] : memref<8x128xf32, #tpu.memory_space<vmem>>, vector<8x128xf32>
    tpu.vector_store %arg14[%c0_30, %c0_31], %58 {strides = array<i32>} : memref<8x128xf32, #tpu.memory_space<vmem>>, vector<8x128xf32>,
    %c1_i32 = arith.constant 1 : i32
    %60 = arith.cmpi eq, %arg1, %c1_i32 : i32
    %61 = arith.extui %60 : i1 to i32
    %c0_i32_32 = arith.constant 0 : i32
    %62 = arith.cmpi ne, %61, %c0_i32_32 : i32
    scf.if %62 {
      %c0_33 = arith.constant 0 : index
      %c0_34 = arith.constant 0 : index
      %63 = vector.load %arg14[%c0_33, %c0_34] : memref<8x128xf32, #tpu.memory_space<vmem>>, vector<8x128xf32>
      %c0_35 = arith.constant 0 : index
      %c0_36 = arith.constant 0 : index
      %64 = vector.load %arg11[%c0_35, %c0_36] : memref<128x128xf32, #tpu.memory_space<vmem>>, vector<128x128xf32>
      %cst_37 = arith.constant dense<0.000000e+00> : vector<8x128xf32>
      %65 = tpu.matmul %63, %64, %cst_37 {dimension_numbers = #tpu.dot_dimension_numbers<[1], [0], [0], [1], [0, 0, 1, 1], [], []>} : vector<8x128xf32>, vector<128x128xf32>, vector<8x128xf32> -> vector<8x128xf32>
      %c0_38 = arith.constant 0 : index
      %c0_39 = arith.constant 0 : index
      %66 = vector.load %arg12[%c0_38, %c0_39] : memref<1x128xf32, #tpu.memory_space<vmem>>, vector<1x128xf32>
      %67 = vector.broadcast %66 : vector<1x128xf32> to vector<8x128xf32>
      %68 = arith.addf %65, %67 : vector<8x128xf32>
      %c0_40 = arith.constant 0 : index
      %c0_41 = arith.constant 0 : index
      %69 = vector.load %arg13[%c0_40, %c0_41] : memref<8x128xf32, #tpu.memory_space<vmem>>, vector<8x128xf32>
      tpu.vector_store %arg13[%c0_40, %c0_41], %68 {strides = array<i32>} : memref<8x128xf32, #tpu.memory_space<vmem>>, vector<8x128xf32>,
    } else {
    }
    return
  }
  func.func @transform_0(%arg0: i32, %arg1: i32) -> (i32, i32) {
    %c0_i32 = arith.constant 0 : i32
    %c0_i32_0 = arith.constant 0 : i32
    return %arg0, %c0_i32 : i32, i32
  }
  func.func @transform_1(%arg0: i32, %arg1: i32) -> (i32, i32) {
    %c0_i32 = arith.constant 0 : i32
    %c0_i32_0 = arith.constant 0 : i32
    %c0_i32_1 = arith.constant 0 : i32
    return %c0_i32, %c0_i32_0 : i32, i32
  }
  func.func @transform_2(%arg0: i32, %arg1: i32) -> (i32, i32) {
    %c0_i32 = arith.constant 0 : i32
    %c0_i32_0 = arith.constant 0 : i32
    %c0_i32_1 = arith.constant 0 : i32
    return %c0_i32, %c0_i32_0 : i32, i32
  }
  func.func @transform_3(%arg0: i32, %arg1: i32) -> (i32, i32, i32) {
    %c0_i32 = arith.constant 0 : i32
    %c0_i32_0 = arith.constant 0 : i32
    %c0_i32_1 = arith.constant 0 : i32
    return %arg1, %c0_i32, %c0_i32_0 : i32, i32, i32
  }
  func.func @transform_4(%arg0: i32, %arg1: i32) -> (i32, i32, i32) {
    %c0_i32 = arith.constant 0 : i32
    %c0_i32_0 = arith.constant 0 : i32
    %c0_i32_1 = arith.constant 0 : i32
    return %arg1, %c0_i32, %c0_i32_0 : i32, i32, i32
  }
  func.func @transform_5(%arg0: i32, %arg1: i32) -> (i32, i32, i32) {
    %c0_i32 = arith.constant 0 : i32
    %c0_i32_0 = arith.constant 0 : i32
    %c0_i32_1 = arith.constant 0 : i32
    return %arg1, %c0_i32, %c0_i32_0 : i32, i32, i32
  }
  func.func @transform_6(%arg0: i32, %arg1: i32) -> (i32, i32, i32) {
    %c0_i32 = arith.constant 0 : i32
    %c0_i32_0 = arith.constant 0 : i32
    %c0_i32_1 = arith.constant 0 : i32
    return %arg1, %c0_i32, %c0_i32_0 : i32, i32, i32
  }
  func.func @transform_7(%arg0: i32, %arg1: i32) -> (i32, i32, i32) {
    %c0_i32 = arith.constant 0 : i32
    %c0_i32_0 = arith.constant 0 : i32
    %c0_i32_1 = arith.constant 0 : i32
    return %arg1, %c0_i32, %c0_i32_0 : i32, i32, i32
  }
  func.func @transform_8(%arg0: i32, %arg1: i32) -> (i32, i32, i32) {
    %c0_i32 = arith.constant 0 : i32
    %c0_i32_0 = arith.constant 0 : i32
    %c0_i32_1 = arith.constant 0 : i32
    return %arg1, %c0_i32, %c0_i32_0 : i32, i32, i32
  }
  func.func @transform_9(%arg0: i32, %arg1: i32) -> (i32, i32) {
    %c0_i32 = arith.constant 0 : i32
    %c0_i32_0 = arith.constant 0 : i32
    %c0_i32_1 = arith.constant 0 : i32
    return %c0_i32, %c0_i32_0 : i32, i32
  }
  func.func @transform_10(%arg0: i32, %arg1: i32) -> (i32, i32) {
    %c0_i32 = arith.constant 0 : i32
    %c0_i32_0 = arith.constant 0 : i32
    %c0_i32_1 = arith.constant 0 : i32
    return %c0_i32, %c0_i32_0 : i32, i32
  }
  func.func @transform_11(%arg0: i32, %arg1: i32) -> (i32, i32) {
    %c0_i32 = arith.constant 0 : i32
    %c0_i32_0 = arith.constant 0 : i32
    return %arg0, %c0_i32 : i32, i32
  }
}

</mosaic_0001>

<bundles_post_ra>
// kernel: tpu_custom_call.1
= control target key start
LH: loop header
LB: loop body
LE: loop exit
PB: predicated region body
PF: predicated region fallthrough
CT: control target
= control target key end

     0   :  { %s2202_s0 = inlined_call_operand.hbm [shape: f32[8,5], index: 0, kind: input, shape index: {}]   ;;  %s2203_s1 = inlined_call_operand.hbm [shape: f32[5,256], index: 1, kind: input, shape index: {}]   ;;  %s2204_s2 = inlined_call_operand.vmem [shape: f32[1,256], index: 2, kind: input, shape index: {}]   ;;  %s2205_s3 = inlined_call_operand.hbm [shape: f32[2,128,256], index: 3, kind: input, shape index: {}]   ;;  %s2206_s4 = inlined_call_operand.vmem [shape: f32[2,1,256], index: 4, kind: input, shape index: {}]   ;;  %s2207_s5 = inlined_call_operand.vmem [shape: f32[2,1,128], index: 5, kind: input, shape index: {}]   ;;  %s2208_s6 = inlined_call_operand.vmem [shape: f32[2,1,128], index: 6, kind: input, shape index: {}]   ;;  %s2209_s7 = inlined_call_operand.hbm [shape: f32[2,128,128], index: 7, kind: input, shape index: {}]   ;;  %s2210_s8 = inlined_call_operand.vmem [shape: f32[2,1,128], index: 8, kind: input, shape index: {}]   ;;  %s2211_s9 = inlined_call_operand.hbm [shape: f32[128,128], index: 9, kind: input, shape index: {}]   ;;  %s2212_s10 = inlined_call_operand.vmem [shape: f32[1,128], index: 10, kind: input, shape index: {}]   ;;  %s2213_s11 = inlined_call_operand.hbm [shape: f32[8,128], index: 11, kind: output, shape index: {}]  }
   0x1   :  { %2224 = sst [smem:[#allocation21_spill]] %s2202_s0 }
   0x2   :  { %2225 = sst [smem:[#allocation22_spill]] %s2203_s1 }
   0x3   :  { %2226 = sst [smem:[#allocation23_spill]] %s2204_s2 }
   0x4   :  { %2227 = sst [smem:[#allocation24_spill]] %s2205_s3 }
   0x5   :  { %2228 = sst [smem:[#allocation25_spill]] %s2210_s8 }
   0x6   :  { %2229 = sst [smem:[#allocation26_spill]] %s2212_s10 }
   0x7   :  { %2230 = sst [smem:[#allocation27_spill]] %s2213_s11 }
   0x8   :  { %16 = vsyncpa [#allocation5], 0 }
   0x9   :  { %17 = vsyncpa [#allocation8], 0 }
   0xa   :  { %18 = vsyncpa [#allocation6], 0  ;;  %s1824_s17 = smov 0   ;;  %s1826_s18 = smov 0  }
   0xb   :  { %s1828_s19 = smov 0   ;;  %s1830_s20 = smov 0  }
   0xc   :  { %s1832_s21 = smov 0   ;;  %s1834_s22 = smov 0  }
   0xd LB: > { %2231 = sst [smem:[#allocation18_spill]] %s1745_s22  ;;  %s1853_s23 = sadd.s32 4294967295, %s1745_s22   ;;  %s1745_s22 = sphi %s1834_s22, %s24_s22   ;;  %s1741_s21 = sphi %s1832_s21, %s2268_s21   ;;  %s1737_s20 = sphi %s1830_s20, %s2267_s20   ;;  %s1733_s19 = sphi %s1828_s19, %s2266_s19   ;;  %s1729_s18 = sphi %s1826_s18, %s2265_s18   ;;  %s1725_s17 = sphi %s1824_s17, %s2264_s17  }
   0xe   : > { %p118_p0 = scmp.ne.s32.totalorder %s1733_s19, %s1729_s18  ;;  %p119_p1 = scmp.eq.s32.totalorder %s1745_s22, 0 }
   0xf   : > { %p124_p2 = scmp.ne.s32.totalorder %s1729_s18, %s1725_s17  ;;  %p2215_p3 = scmp.eq.s32.totalorder %s1853_s23, 0 }
  0x10   : > { %p120_p4 = por %p119_p1, %p118_p0  ;;  %p1171_p5 = scmp.ge.s32.totalorder %s1745_s22, 1 }
  0x11   : > { %p1864_p6 = por %p2215_p3, %p124_p2  ;;  %p333_p7 = scmp.lt.s32.totalorder %s1745_s22, 3 }
  0x12   : > { %s1747_s27 = smov [#allocation4]   ;;  %p1430_p10 = scmp.lt.s32.totalorder %s1745_s22, 2 }
  0x13   : > { %s2232_s25 = scalar_select %p1864_p6, 1, 0 }
  0x14   : > { %p1869_p8 = pnand %p1171_p5, %p333_p7  ;;  %s348_s28 = sshll.u32 %s1747_s27, 4  ;;  %s349_s28 = int_to_ptr.vmem [resolvable:$true] %s348_s28 }
  0x15   : > { %p1882_p12 = pnand %p1430_p10, %p120_p4  ;;  %s1748_s12 = smov [#allocation7]  }
  0x16   : > { %s2233_s26 = scalar_select %p1869_p8, 1, 0 }
  0x17   : > { %p1410_p9 = pneg %p1869_p8  ;;  %s359_s13 = sshll.u32 %s1748_s12, 4  ;;  %s360_s13 = int_to_ptr.vmem [resolvable:$true] %s359_s13 }
  0x18   : > { %s2235_s30 = scalar_select %p1882_p12, 1, 0 }
  0x19   : > { %p1878_p11 = pnand %p1410_p9, %p2215_p3  ;;  %s2236_s0 = sld [smem:[#allocation21_spill]] }
  0x1b   : > { %s2234_s29 = scalar_select %p1878_p11, 1, 0 }
  0x1c   : > { %p1894_p0 = pneg %p1878_p11 }
  0x1f   : > { %s1509_s16 = scalar_lea.hbm %s2236_s0, 128 }
  0x20   : > { %p1510_p13 = scmp.ne.s32.totalorder %s2236_s0, %s1509_s16  ;;  %p1516_p4 = scmp.lt.u32.totalorder %s1509_s16, %s2236_s0 }
  0x22   : > { %p1512_p1 = pnand %p1894_p0, %p1510_p13 }
  0x24   : > { %p1513_p2 = pneg %p1512_p1 }
  0x26   : > { %p1518_p5 = pnand %p1516_p4, %p1513_p2 }
  0x28   : > { %1521 = shalt.err (!%p1518_p5)
}
  0x29   : > { %s1522_s12 = scalar_lea.vmem %s349_s28, 128  ;;  %p1530_p3 = scmp.lt.s32.totalorder %s349_s28, %s349_s28 }
  0x2a   : > { %p1523_p7 = scmp.ne.s32.totalorder %s349_s28, %s1522_s12  ;;  %p1531_p6 = scmp.lt.s32.totalorder %s1522_s12, %s1522_s12 }
  0x2c   : > { %p1525_p9 = pnand %p1523_p7, %p1894_p0  ;;  %p1532_p8 = por %p1531_p6, %p1530_p3 }
  0x2e   : > { %p1526_p10 = pneg %p1525_p9 }
  0x30   : > { %p1533_p12 = pnand %p1532_p8, %p1526_p10 }
  0x32   : > { %1536 = shalt.err (!%p1533_p12)
}
  0x33   : > { %1413 = dma.hbm_to_vmem [thread:$0]  (!%p1878_p11), %s2236_s0, 128, %s349_s28, [#allocation5]  }
  0x34   : > { %s33_s10 = sadd.s32 1, %s1741_s21  ;;  %s2238_s1 = sld [smem:[#allocation22_spill]] }
  0x3a   : > { %s1537_s17 = scalar_lea.hbm %s2238_s1, 256 }
  0x3b   : > { %p1538_p3 = scmp.ne.s32.totalorder %s2238_s1, %s1537_s17  ;;  %p1544_p12 = scmp.lt.u32.totalorder %s1537_s17, %s2238_s1 }
  0x3d   : > { %p1540_p6 = pnand %p1538_p3, %p1894_p0 }
  0x3f   : > { %p1541_p8 = pneg %p1540_p6 }
  0x41   : > { %p1546_p13 = pnand %p1544_p12, %p1541_p8 }
  0x43   : > { %1549 = shalt.err (!%p1546_p13)
}
  0x44   : > { %s1550_s28 = scalar_lea.vmem %s360_s13, 256  ;;  %p1558_p5 = scmp.lt.s32.totalorder %s360_s13, %s360_s13 }
  0x45   : > { %p1551_p1 = scmp.ne.s32.totalorder %s360_s13, %s1550_s28  ;;  %p1559_p7 = scmp.lt.s32.totalorder %s1550_s28, %s1550_s28 }
  0x47   : > { %p1553_p2 = pnand %p1551_p1, %p1894_p0  ;;  %p1560_p9 = por %p1559_p7, %p1558_p5 }
  0x49   : > { %p1554_p4 = pneg %p1553_p2 }
  0x4b   : > { %p1561_p10 = pnand %p1560_p9, %p1554_p4 }
  0x4d   : > { %1564 = shalt.err (!%p1561_p10)
}
  0x4e   : > { %1416 = dma.hbm_to_vmem [thread:$0]  (!%p1878_p11), %s2238_s1, 256, %s360_s13, [#allocation8]  }
  0x4f   : > { %p34_p3 = scmp.ge.s32.totalorder %s33_s10, 2  ;;  %s389_s8 = sand.u32 1, %s1745_s22  }
  0x50   : > { %s2219_s15 = sand.u32 1, %s1733_s19   ;;  %s1204_s16 = sshll.u32 %s1741_s21, 12 }
  0x51   : > { %s2270_s10 = smov (%p34_p3, %s33_s10), 0  ;;  %s1176_s11 = sshll.u32 %s2219_s15, 8 }
  0x52   : > { %2239 = sst [smem:[#allocation19_spill]] %s2270_s10  ;;  %s108_s17 = ssub.s32 %s1741_s21, %s2270_s10 }
  0x53   : > { %p109_p6 = scmp.eq.s32.totalorder %s108_s17, 0  ;;  %s2240_s3 = sld [smem:[#allocation24_spill]] }
  0x54   : > { %s393_s13 = scalar_lea.vmem [#allocation9], %s1176_s11  ;;  %s2241_s14 = sadd.s32 1, %s1733_s19 }
  0x55   : > { %s400_s2 = sshll.u32 %s393_s13, 4  ;;  %s1950_s15 = scalar_lea.sflag [#allocation5], %s389_s8  ;;  %s1948_s2 = int_to_ptr.vmem [resolvable:$true] %s400_s2 }
  0x56   : > { %s1946_s0 = scalar_select %p109_p6, %s1733_s19, %s2241_s14  }
  0x57   : > { %p2243_p12 = scmp.ne.s32.totalorder %s2235_s30, 0 }
  0x58   : > { %2242 = sst [smem:[#allocation20_spill]] %s1946_s0 }
  0x59   : > { %s1941_s28 = scalar_lea.hbm %s2240_s3, %s1204_s16  ;;  %p2223_p13 = pneg %p2243_p12 }
  0x5a   : > { %s1565_s1 = scalar_lea.hbm %s1941_s28, 4096  ;;  %s1570_s11 = scalar_lea.hbm %s2240_s3, 8192 }
  0x5b   : > { %p1566_p8 = scmp.ne.s32.totalorder %s1941_s28, %s1565_s1  ;;  %p1571_p4 = scmp.lt.u32.totalorder %s1941_s28, %s2240_s3 }
  0x5c   : > { %p1572_p5 = scmp.lt.u32.totalorder %s1570_s11, %s1565_s1  ;;  %p1574_p9 = scmp.lt.u32.totalorder %s1565_s1, %s1941_s28 }
  0x5d   : > { %p1568_p1 = pnand %p2223_p13, %p1566_p8 }
  0x5e   : > { %p1573_p7 = por %p1572_p5, %p1571_p4 }
  0x5f   : > { %p1569_p2 = pneg %p1568_p1 }
  0x60   : > { %p1575_p10 = por %p1574_p9, %p1573_p7 }
  0x62   : > { %p1576_p3 = pnand %p1575_p10, %p1569_p2 }
  0x64   : > { %1579 = shalt.err (!%p1576_p3)
}
  0x65   : > { %s1580_s8 = scalar_lea.vmem %s1948_s2, 4096  ;;  %s1749_s13 = smov [#allocation9]  }
  0x66   : > { %p1581_p6 = scmp.ne.s32.totalorder %s1948_s2, %s1580_s8  ;;  %s1585_s14 = sshll.u32 %s1749_s13, 4  ;;  %s1586_s14 = int_to_ptr.vmem [resolvable:$false] %s1585_s14 }
  0x67   : > { %s1587_s16 = scalar_lea.vmem %s1586_s14, 8192  ;;  %p1588_p11 = scmp.lt.s32.totalorder %s1948_s2, %s1586_s14 }
  0x68   : > { %p1583_p8 = pnand %p1581_p6, %p2223_p13  ;;  %p1589_p4 = scmp.lt.s32.totalorder %s1587_s16, %s1580_s8 }
  0x6a   : > { %p1584_p1 = pneg %p1583_p8  ;;  %p1590_p5 = por %p1589_p4, %p1588_p11 }
  0x6c   : > { %p1591_p7 = pnand %p1590_p5, %p1584_p1 }
  0x6e   : > { %1594 = shalt.err (!%p1591_p7)
}
  0x6f   : > { %s1750_s1 = smov 256   ;;  %s1751_s17 = smov 16  }
  0x70   : > { %1423 = dma.hbm_to_vmem [thread:$0]  (!%p2243_p12), %s1941_s28, 4096, %s1948_s2, %s1950_s15, %s1750_s1, %s1750_s1, %s1751_s17  }
  0x71   : > { %s1752_s11 = smov [#allocation11]   ;;  %s2244_s12 = sand.u32 1, %s1733_s19  }
  0x72   : > { %s372_s27 = sshll.u32 %s1752_s11, 4  ;;  %s1179_s13 = sshll.u32 %s2244_s12, 7  ;;  %s373_s27 = int_to_ptr.vmem [resolvable:$true] %s372_s27 }
  0x73   : > { %s1595_s16 = scalar_lea.hbm %s2211_s9, 2048 }
  0x74   : > { %p1596_p11 = scmp.ne.s32.totalorder %s2211_s9, %s1595_s16  ;;  %p1602_p10 = scmp.lt.u32.totalorder %s1595_s16, %s2211_s9 }
  0x76   : > { %p1598_p2 = pnand %p1596_p11, %p1894_p0 }
  0x78   : > { %p1599_p9 = pneg %p1598_p2 }
  0x7a   : > { %p1604_p3 = pnand %p1602_p10, %p1599_p9 }
  0x7c   : > { %1607 = shalt.err (!%p1604_p3)
}
  0x7d   : > { %s1608_s28 = scalar_lea.vmem %s373_s27, 2048  ;;  %p1616_p4 = scmp.lt.s32.totalorder %s373_s27, %s373_s27 }
  0x7e   : > { %p1609_p6 = scmp.ne.s32.totalorder %s373_s27, %s1608_s28  ;;  %p1617_p5 = scmp.lt.s32.totalorder %s1608_s28, %s1608_s28 }
  0x80   : > { %p1611_p8 = pnand %p1609_p6, %p1894_p0  ;;  %p1618_p7 = por %p1617_p5, %p1616_p4 }
  0x82   : > { %p1612_p1 = pneg %p1611_p8 }
  0x84   : > { %p1619_p13 = pnand %p1618_p7, %p1612_p1 }
  0x86   : > { %1622 = shalt.err (!%p1619_p13)
}
  0x87   : > { %s1753_s3 = smov 128   ;;  %s1754_s10 = smov 8  }
  0x88   : > { %p2245_p11 = scmp.ne.s32.totalorder %s2234_s29, 0  ;;  %s1205_s24 = sshll.u32 %s1741_s21, 11 }
  0x89   : > { %s2005_s17 = scalar_lea.hbm %s2209_s7, %s1205_s24  ;;  %s433_s11 = scalar_lea.vmem [#allocation10], %s1179_s13 }
  0x8a   : > { %1419 = dma.hbm_to_vmem [thread:$0]  (!%p2245_p11), %s2211_s9, 2048, %s373_s27, [#allocation8], %s1753_s3, %s1753_s3, %s1754_s10  }
  0x8b   : > { %s440_s12 = sshll.u32 %s433_s11, 4  ;;  %s1623_s29 = scalar_lea.hbm %s2005_s17, 2048  ;;  %s2007_s12 = int_to_ptr.vmem [resolvable:$true] %s440_s12 }
  0x8c   : > { %p1624_p0 = scmp.ne.s32.totalorder %s2005_s17, %s1623_s29  ;;  %p2246_p13 = pneg %p2243_p12 }
  0x8d   : > { %s1628_s8 = scalar_lea.hbm %s2209_s7, 4096  ;;  %p1629_p10 = scmp.lt.u32.totalorder %s2005_s17, %s2209_s7 }
  0x8e   : > { %p1626_p2 = pnand %p1624_p0, %p2246_p13  ;;  %p1630_p3 = scmp.lt.u32.totalorder %s1628_s8, %s1623_s29 }
  0x8f   : > { %p1632_p8 = scmp.lt.u32.totalorder %s1623_s29, %s2005_s17 }
  0x90   : > { %p1627_p9 = pneg %p1626_p2  ;;  %p1631_p6 = por %p1630_p3, %p1629_p10 }
  0x92   : > { %p1633_p1 = por %p1632_p8, %p1631_p6 }
  0x94   : > { %p1634_p4 = pnand %p1633_p1, %p1627_p9 }
  0x96   : > { %1637 = shalt.err (!%p1634_p4)
}
  0x97   : > { %s1638_s13 = scalar_lea.vmem %s2007_s12, 2048  ;;  %p2247_p7 = pmov %p2246_p13 }
  0x98   : > { %p1639_p5 = scmp.ne.s32.totalorder %s2007_s12, %s1638_s13  ;;  %s1755_s0 = smov [#allocation10]  }
  0x99   : > { %s1643_s22 = sshll.u32 %s1755_s0, 4  ;;  %s1644_s22 = int_to_ptr.vmem [resolvable:$false] %s1643_s22 }
  0x9a   : > { %p1641_p11 = pnand %p1639_p5, %p2247_p7  ;;  %s1645_s24 = scalar_lea.vmem %s1644_s22, 4096 }
  0x9b   : > { %p1646_p13 = scmp.lt.s32.totalorder %s2007_s12, %s1644_s22  ;;  %p1647_p2 = scmp.lt.s32.totalorder %s1645_s24, %s1638_s13 }
  0x9c   : > { %p1642_p0 = pneg %p1641_p11 }
  0x9d   : > { %p1648_p10 = por %p1647_p2, %p1646_p13 }
  0x9f   : > { %p1649_p3 = pnand %p1648_p10, %p1642_p0 }
  0xa1   : > { %1652 = shalt.err (!%p1649_p3)
}
  0xa2   : > { %1426 = dma.hbm_to_vmem [thread:$0]  (!%p2243_p12), %s2005_s17, 2048, %s2007_s12, %s1950_s15, %s1753_s3, %s1753_s3, %s1754_s10  }
  0xa3   : > { %p2248_p9 = scmp.ne.s32.totalorder %s2233_s26, 0 }
  0xa4   : > { %p2249_p6 = scmp.eq.s32.totalorder (!%p2248_p9), %s1853_s23, 0 }
  0xa5   : > { %458 = sbr.rel (%p2248_p9) target bundleno = 1267 (0x4f3), region = 64 }
  0xac   : > { %1704 = dma.done.wait (%p2249_p6), [#allocation5], 128   ;;  %p2250_p8 = pmov %p2249_p6 }
  0xad   : > { %p2251_p1 = pmov %p2249_p6 }
  0xae   : > { %1706 = vsyncadd (%p2250_p8), [#allocation5], 4294967168 }
  0xaf   : > { %1708 = dma.done.wait (%p2251_p1), [#allocation8], 256   ;;  %p2252_p4 = pmov %p2251_p1 }
  0xb0   : > { %s468_s30 = sand.u32 1, %s1853_s23   ;;  %s470_s15 = sand.u32 1, %s1729_s18  }
  0xb1   : > { %1710 = vsyncadd (%p2252_p4), [#allocation8], 4294967040  ;;  %s1185_s3 = sshll.u32 %s470_s15, 8  ;;  %s469_s26 = scalar_lea.sflag [#allocation5], %s468_s30 }
  0xb2   : > { %s2048_s10 = scalar_lea.vmem [#allocation9], %s1185_s3  ;;  %p2253_p12 = scmp.ne.s32.totalorder %s2232_s25, 0 }
  0xb4   : > { %1712 = dma.done.wait (%p2253_p12), %s469_s26, 6144  }
  0xb5   : > { %1714 = vsyncadd (%p2253_p12), %s469_s26, 4294961152  ;;  %s1186_s2 = sshll.u32 %s470_s15, 7  ;;  %p2254_p5 = pmov %p2251_p1 }
  0xb6   : > { %s2054_s1 = scalar_lea.vmem [#allocation10], %s1186_s2 }
  0xb7   : > { %1716 = dma.done.wait (%p2254_p5), [#allocation8], 2048   ;;  %p2255_p7 = pmov %p2251_p1 }
  0xb8   : > { %p537_p11 = scmp.lt.s32.totalorder %s1737_s20, 1  ;;  %s2256_s24 = sld [smem:[#allocation25_spill]] }
  0xb9   : > { %1718 = vsyncadd (%p2255_p7), [#allocation8], 4294965248  ;;  %p1189_p0 = scmp.ne.s32.totalorder %s1737_s20, 0 }
  0xba   : > { %s2062_s17 = scalar_select %p537_p11, %s1737_s20, 1 }
  0xbb   : > { %553 = sbr.rel (%p1189_p0) target bundleno = 434 (0x1b2), region = 88  ;;  %v556_v0 = vld [vmem:[#allocation7 + $0x8] sm:$0x1f] (!%p1189_p0)  ;;  %vm573_vm0 = vcmask (!%p1189_p0), 1044480   ;;  %v555_v1 = vld [vmem:[#allocation7] sm:$0x1f] (!%p1189_p0)  ;;  %v559_v4 = vlaneseq (!%p1189_p0) }
  0xbc   : > { %s1188_s25 = sshll.u32 %s2062_s17, 1  ;;  %s543_s29 = scalar_lea.vmem %s2207_s5, %s2062_s17  ;;  %1190 = vmatprep.subr.msk.mxu0 (!%p1189_p0), %vm573_vm0, %v556_v0  ;;  %v1756_v2 = vmov (!%p1189_p0), 0.0   ;;  %v554_v3 = vld [vmem:[#allocation4] sm:$0xff] (!%p1189_p0)  ;;  %vm569_vm1 = vcmask (!%p1189_p0), 39936  }
  0xbd   : > { %s2072_s8 = scalar_lea.vmem %s2206_s4, %s1188_s25  ;;  %s546_s13 = scalar_lea.vmem %s2208_s6, %s2062_s17  ;;  %644 = vmatprep.mubr.f32.mxu0 (!%p1189_p0), %v1756_v2  ;;  %1191 = vmatpush1.msk.msra.mxu0 (!%p1189_p0), %vm573_vm0, %v555_v1  ;;  %v560_v5 = vshrl.u32 (!%p1189_p0), %v559_v4, 7 }
  0xbe   : > { %s549_s30 = scalar_lea.vmem %s2256_s24, %s2062_s17  ;;  %1192 = vmatmul.mubr.msk.f32.vlgmr.msra.gmra.mrb[0].mxu0 (!%p1189_p0), %vm569_vm1, %v554_v3  ;;  %s2257_s26 = sld [smem:[#allocation23_spill]] (!%p1189_p0) }
  0xbf   : > { %v561_v6 = vsub.s32 (!%p1189_p0), 0, %v560_v5  ;;  %v565_v8 = vsub.s32 (!%p1189_p0), 1, %v560_v5 }
  0xc4   : > { %v557_v7 = vld [vmem:[%s2257_s26] sm:$0x3] }
  0xc5   : > { %v562_v9 = vrot.slane %v557_v7, %v561_v6  ;;  %v566_v10 = vrot.slane %v557_v7, %v565_v8 }
 0x191   : > { %v646_v11 = vpop.f32.mrb[0].mxu0 }
 0x192   : > { %v647_v12 = vadd.f32 %v646_v11, %v562_v9  ;;  %v648_v13 = vpop.f32.mrb[1].mxu0 }
 0x193   : > { %v649_v14 = vadd.f32 %v648_v13, %v566_v10 }
 0x194   : > { %651 = vst [vmem:[#allocation2] sm:$0xff] %v647_v12 }
 0x195   : > { %v1193_v15 = vmul.f32 -1.442695, %v649_v14 }
 0x197   : > { %1499 = vpow2.f32 %v1193_v15 }
 0x1a1   : > { %v1500_v16 = vpop.eup %1499 }
 0x1a2   : > { %v655_v17 = vadd.f32 1.0, %v1500_v16 }
 0x1a4   : > { %1501 = vrcp.f32 %v655_v17 }
 0x1ae   : > { %v1502_v18 = vpop.eup %1501 }
 0x1af   : > { %v658_v19 = vmul.f32 %v1502_v18, %v649_v14 }
 0x1b1   : > { %659 = vst [vmem:[#allocation3] sm:$0xff] %v658_v19 }
 0x1b2 PF: > { %v2086_v20 = vld [vmem:[#allocation2] sm:$0xff]  ;;  %v693_v21 = vld [vmem:[%s2048_s10 + $0x8] sm:$0xff]  ;;  %v692_v24 = vld [vmem:[%s2048_s10] sm:$0xff]  ;;  %v1757_v27 = vmov 0.0   ;;  %v1758_v3 = vmov 0.0|0.0   ;;  %vm1759_vm2 = vmmov 0  }
 0x1b3   : > { %v695_v22 = vld [vmem:[%s2048_s10 + $0x18] sm:$0xff]  ;;  %661 = vadd.xlane.f32.xlu0 %v2086_v20  ;;  %v694_v25 = vld [vmem:[%s2048_s10 + $0x10] sm:$0xff]  ;;  %v697_v26 = vld [vmem:[%s2048_s10 + $0x28] sm:$0xff]  ;;  %800 = vmatprep.mubr.f32.mxu0 %v1757_v27  ;;  %p1198_p13 = scmp.ne.s32.totalorder %s1737_s20, 1 }
 0x1b4   : > { %v1310_v23 = vpack.c.bf16 %v695_v22, %v693_v21  ;;  %v1312_v28 = vpack.c.bf16 %v694_v25, %v692_v24  ;;  %v699_v29 = vld [vmem:[%s2048_s10 + $0x38] sm:$0xff]  ;;  %v696_v30 = vld [vmem:[%s2048_s10 + $0x20] sm:$0xff]  ;;  %v698_v31 = vld [vmem:[%s2048_s10 + $0x30] sm:$0xff]  ;;  %1342 = vmatprep.subr.bf16.mxu1 %v1758_v3  ;;  %1272 = vmatprep.mubr.msk.f32.mxu1 %vm1759_vm2, %v1757_v27  ;;  %vm1761_vm3 = vmmov (!%p1198_p13), 0  }
 0x1b5   : > { %v1314_v32 = vpack.c.bf16 %v699_v29, %v697_v26  ;;  %v701_v33 = vld [vmem:[%s2048_s10 + $0x48] sm:$0xff]  ;;  %v703_v34 = vld [vmem:[%s2048_s10 + $0x58] sm:$0xff]  ;;  %v1316_v35 = vpack.c.bf16 %v698_v31, %v696_v30  ;;  %v700_v37 = vld [vmem:[%s2048_s10 + $0x40] sm:$0xff] }
 0x1b6   : > { %1311 = vmatprep.subr.bf16.mxu0 %v1310_v23  ;;  %v1318_v36 = vpack.c.bf16 %v703_v34, %v701_v33  ;;  %v702_v38 = vld [vmem:[%s2048_s10 + $0x50] sm:$0xff]  ;;  %v705_v39 = vld [vmem:[%s2048_s10 + $0x68] sm:$0xff]  ;;  %v707_v40 = vld [vmem:[%s2048_s10 + $0x78] sm:$0xff] }
 0x1b7   : > { %1313 = vmatpush1.bf16.msra.mxu0 %v1312_v28  ;;  %v1320_v41 = vpack.c.bf16 %v702_v38, %v700_v37  ;;  %v1322_v42 = vpack.c.bf16 %v707_v40, %v705_v39  ;;  %v704_v43 = vld [vmem:[%s2048_s10 + $0x60] sm:$0xff]  ;;  %v706_v44 = vld [vmem:[%s2048_s10 + $0x70] sm:$0xff]  ;;  %v709_v45 = vld [vmem:[%s2048_s10 + $0x88] sm:$0xff] }
 0x1b8   : > { %1315 = vmatprep.subr.bf16.mxu0 %v1314_v32  ;;  %v711_v46 = vld [vmem:[%s2048_s10 + $0x98] sm:$0xff]  ;;  %v1324_v47 = vpack.c.bf16 %v706_v44, %v704_v43  ;;  %v708_v49 = vld [vmem:[%s2048_s10 + $0x80] sm:$0xff]  ;;  %v710_v50 = vld [vmem:[%s2048_s10 + $0x90] sm:$0xff] }
 0x1b9   : > { %v1326_v48 = vpack.c.bf16 %v711_v46, %v709_v45  ;;  %v713_v51 = vld [vmem:[%s2048_s10 + $0xa8] sm:$0xff]  ;;  %v715_v52 = vld [vmem:[%s2048_s10 + $0xb8] sm:$0xff]  ;;  %v1328_v53 = vpack.c.bf16 %v710_v50, %v708_v49  ;;  %v712_v55 = vld [vmem:[%s2048_s10 + $0xa0] sm:$0xff]  ;;  %v726_v45 = vlaneseq }
 0x1ba   : > { %v1330_v54 = vpack.c.bf16 %v715_v52, %v713_v51  ;;  %v714_v56 = vld [vmem:[%s2048_s10 + $0xb0] sm:$0xff]  ;;  %v717_v57 = vld [vmem:[%s2048_s10 + $0xc8] sm:$0xff]  ;;  %v719_v58 = vld [vmem:[%s2048_s10 + $0xd8] sm:$0xff] }
 0x1bb   : > { %1317 = vmatpush1.bf16.msra.mxu0 %v1316_v35  ;;  %v1332_v59 = vpack.c.bf16 %v714_v56, %v712_v55  ;;  %v716_v60 = vld [vmem:[%s2048_s10 + $0xc0] sm:$0xff]  ;;  %v1334_v61 = vpack.c.bf16 %v719_v58, %v717_v57  ;;  %v718_v62 = vld [vmem:[%s2048_s10 + $0xd0] sm:$0xff]  ;;  %v811_v0 = vld [vmem:[%s2054_s1 + $0x8] sm:$0xff] }
 0x1bc   : > { %1319 = vmatprep.subr.bf16.mxu0 %v1318_v36  ;;  %v810_v63 = vld [vmem:[%s2054_s1] sm:$0xff]  ;;  %v721_v1 = vld [vmem:[%s2048_s10 + $0xe8] sm:$0xff]  ;;  %v723_v2 = vld [vmem:[%s2048_s10 + $0xf8] sm:$0xff]  ;;  %v1336_v5 = vpack.c.bf16 %v718_v62, %v716_v60 }
 0x1bd   : > { %v1343_v4 = vpack.c.bf16 %v811_v0, %v810_v63  ;;  %v1338_v6 = vpack.c.bf16 %v723_v2, %v721_v1  ;;  %v720_v7 = vld [vmem:[%s2048_s10 + $0xe0] sm:$0xff]  ;;  %v722_v8 = vld [vmem:[%s2048_s10 + $0xf0] sm:$0xff]  ;;  %v813_v16 = vld [vmem:[%s2054_s1 + $0x18] sm:$0xff] }
 0x1be   : > { %v1340_v9 = vpack.c.bf16 %v722_v8, %v720_v7  ;;  %v691_v10 = vld [vmem:[#allocation3] sm:$0xff]  ;;  %v812_v15 = vld [vmem:[%s2054_s1 + $0x10] sm:$0xff]  ;;  %v815_v19 = vld [vmem:[%s2054_s1 + $0x28] sm:$0xff] }
 0x1bf   : > { %1321 = vmatpush1.bf16.msra.mxu0 %v1320_v41  ;;  %1344 = vmatpush3.bf16.msra.mxu1 %v1343_v4  ;;  %v1346_v17 = vpack.c.bf16 %v813_v16, %v812_v15  ;;  %v814_v18 = vld [vmem:[%s2054_s1 + $0x20] sm:$0xff]  ;;  %v816_v22 = vld [vmem:[%s2054_s1 + $0x30] sm:$0xff]  ;;  %v817_v23 = vld [vmem:[%s2054_s1 + $0x38] sm:$0xff]  ;;  %v1762_v15 = vmov (!%p1198_p13), 0.0  }
 0x1c0   : > { %1323 = vmatprep.subr.bf16.mxu0 %v1322_v42  ;;  %1345 = vmatprep.subr.bf16.mxu1 %v1758_v3  ;;  %v1349_v21 = vpack.c.bf16 %v815_v19, %v814_v18  ;;  %v1352_v24 = vpack.c.bf16 %v817_v23, %v816_v22  ;;  %v818_v25 = vld [vmem:[%s2054_s1 + $0x40] sm:$0xff]  ;;  %v819_v26 = vld [vmem:[%s2054_s1 + $0x48] sm:$0xff]  ;;  %v820_v29 = vld [vmem:[%s2054_s1 + $0x50] sm:$0xff] }
 0x1c1   : > { %v1355_v28 = vpack.c.bf16 %v819_v26, %v818_v25  ;;  %v821_v30 = vld [vmem:[%s2054_s1 + $0x58] sm:$0xff]  ;;  %v822_v32 = vld [vmem:[%s2054_s1 + $0x60] sm:$0xff]  ;;  %v823_v33 = vld [vmem:[%s2054_s1 + $0x68] sm:$0xff] }
 0x1c2   : > { %v1358_v31 = vpack.c.bf16 %v821_v30, %v820_v29  ;;  %v1361_v34 = vpack.c.bf16 %v823_v33, %v822_v32  ;;  %v824_v35 = vld [vmem:[%s2054_s1 + $0x70] sm:$0xff]  ;;  %v825_v36 = vld [vmem:[%s2054_s1 + $0x78] sm:$0xff]  ;;  %v922_v18 = vld [vmem:[#allocation11 + $0x28] sm:$0xff] (!%p1198_p13) }
 0x1c3   : > { %1325 = vmatpush1.bf16.msra.mxu0 %v1324_v47  ;;  %1347 = vmatpush3.bf16.msra.mxu1 %v1346_v17  ;;  %v1364_v37 = vpack.c.bf16 %v825_v36, %v824_v35  ;;  %v727_v47 = vshrl.u32 %v726_v45, 7  ;;  %v724_v49 = vld [vmem:[%s2072_s8] sm:$0x3]  ;;  %v921_v17 = vld [vmem:[#allocation11 + $0x20] sm:$0xff] (!%p1198_p13)  ;;  %v923_v19 = vld [vmem:[#allocation11 + $0x30] sm:$0xff] (!%p1198_p13) }
 0x1c4   : > { %1327 = vmatprep.subr.bf16.mxu0 %v1326_v48  ;;  %1348 = vmatprep.subr.bf16.mxu1 %v1758_v3  ;;  %v1194_v27 = vld [vmem:[%s543_s29] ss:$0 sm:$0xff]  ;;  %v925_v23 = vld [vmem:[#allocation11 + $0x40] sm:$0xff] (!%p1198_p13)  ;;  %v927_v26 = vld [vmem:[#allocation11 + $0x50] sm:$0xff] (!%p1198_p13)  ;;  %s2259_s29 = sld [smem:[#allocation26_spill]] (!%p1198_p13) }
 0x1c5   : > { %v732_v48 = vsub.s32 1, %v727_v47  ;;  %v728_v52 = vsub.s32 0, %v727_v47  ;;  %v1196_v63 = vld [vmem:[%s549_s30] ss:$0 sm:$0xff]  ;;  %v929_v30 = vld [vmem:[#allocation11 + $0x60] sm:$0xff] (!%p1198_p13)  ;;  %v931_v33 = vld [vmem:[#allocation11 + $0x70] sm:$0xff] (!%p1198_p13) }
 0x1c7   : > { %1329 = vmatpush1.bf16.msra.mxu0 %v1328_v53  ;;  %1350 = vmatpush3.bf16.msra.mxu1 %v1349_v21  ;;  %v733_v50 = vrot.slane %v724_v49, %v732_v48  ;;  %v729_v57 = vrot.slane %v724_v49, %v728_v52  ;;  %v924_v21 = vld [vmem:[#allocation11 + $0x38] sm:$0xff] (!%p1198_p13) }
 0x1c8   : > { %1331 = vmatprep.subr.bf16.mxu0 %v1330_v54  ;;  %1351 = vmatprep.subr.bf16.mxu1 %v1758_v3  ;;  %v1195_v54 = vld [vmem:[%s546_s13] ss:$0 sm:$0xff]  ;;  %v1376_v22 = vpack.c.bf16 (!%p1198_p13), %v924_v21, %v923_v19 }
 0x1cb   : > { %1333 = vmatpush1.bf16.msra.mxu0 %v1332_v59  ;;  %1353 = vmatpush3.bf16.msra.mxu1 %v1352_v24  ;;  %v926_v24 = vld [vmem:[#allocation11 + $0x48] sm:$0xff] (!%p1198_p13) }
 0x1cc   : > { %1335 = vmatprep.subr.bf16.mxu0 %v1334_v61  ;;  %1354 = vmatprep.subr.bf16.mxu1 %v1758_v3  ;;  %v1379_v25 = vpack.c.bf16 (!%p1198_p13), %v926_v24, %v925_v23 }
 0x1cf   : > { %1337 = vmatpush1.bf16.msra.mxu0 %v1336_v5  ;;  %1356 = vmatpush3.bf16.msra.mxu1 %v1355_v28  ;;  %v928_v28 = vld [vmem:[#allocation11 + $0x58] sm:$0xff] (!%p1198_p13) }
 0x1d0   : > { %1339 = vmatprep.subr.bf16.mxu0 %v1338_v6  ;;  %1357 = vmatprep.subr.bf16.mxu1 %v1758_v3  ;;  %v1382_v29 = vpack.c.bf16 (!%p1198_p13), %v928_v28, %v927_v26 }
 0x1d3   : > { %1341 = vmatpush1.bf16.msra.mxu0 %v1340_v9  ;;  %1359 = vmatpush3.bf16.msra.mxu1 %v1358_v31  ;;  %v917_v9 = vld [vmem:[#allocation11] sm:$0xff] (!%p1198_p13)  ;;  %v930_v31 = vld [vmem:[#allocation11 + $0x68] sm:$0xff] (!%p1198_p13) }
 0x1d4   : > { %1360 = vmatprep.subr.bf16.mxu1 %v1758_v3  ;;  %v1385_v32 = vpack.c.bf16 (!%p1198_p13), %v930_v31, %v929_v30 }
 0x1d6   : > { %801 = vmatmul.mubr.f32.vlgmr.msra.gmra.mrb[0].mxu0 %v691_v10  ;;  %v918_v10 = vld [vmem:[#allocation11 + $0x8] sm:$0xff] (!%p1198_p13) }
 0x1d7   : > { %1362 = vmatpush3.bf16.msra.mxu1 %v1361_v34  ;;  %1307 = vmatprep.mubr.msk.f32.mxu0 (!%p1198_p13), %vm1761_vm3, %v1762_v15  ;;  %v932_v34 = vld [vmem:[#allocation11 + $0x78] sm:$0xff] (!%p1198_p13) }
 0x1d8   : > { %1363 = vmatprep.subr.bf16.mxu1 %v1758_v3  ;;  %v1388_v35 = vpack.c.bf16 (!%p1198_p13), %v932_v34, %v931_v33 }
 0x1db   : > { %1365 = vmatpush3.bf16.msra.mxu1 %v1364_v37  ;;  %v1199_v37 = vld [vmem:[%s2259_s29] ss:$0 sm:$0xff] (!%p1198_p13) }
 0x240   : > { %v662_v11 = vpop.xlane.xlu0 %661 }
 0x241   : > { %v663_v12 = vmul.f32 0.03125, %v662_v11  ;;  %v919_v11 = vld [vmem:[#allocation11 + $0x10] sm:$0xff] (!%p1198_p13) }
 0x243   : > { %v664_v13 = vsub.f32 %v2086_v20, %v663_v12  ;;  %v668_v40 = vmul.f32 %v663_v12, %v663_v12  ;;  %v1760_v12 = vmov (!%p1198_p13), 0.0|0.0  }
 0x244   : > { %1366 = vmatprep.subr.bf16.mxu0 (!%p1198_p13), %v1760_v12 }
 0x245   : > { %v665_v14 = vmul.f32 %v664_v13, %v664_v13  ;;  %v669_v41 = vmul.f32 96.0, %v668_v40 }
 0x247   : > { %666 = vadd.xlane.f32.xlu0 %v665_v14  ;;  %v920_v14 = vld [vmem:[#allocation11 + $0x18] sm:$0xff] (!%p1198_p13) }
 0x248   : > { %v1370_v16 = vpack.c.bf16 (!%p1198_p13), %v920_v14, %v919_v11 }
 0x2a9   : > { %v802_v38 = vpop.f32.mrb[0].mxu0 }
 0x2aa   : > { %v804_v39 = vpop.f32.mrb[1].mxu0  ;;  %v803_v60 = vadd.f32 %v802_v38, %v729_v57 }
 0x2ab   : > { %v805_v56 = vadd.f32 %v804_v39, %v733_v50 }
 0x2d4   : > { %v667_v42 = vpop.xlane.xlu0 %666 }
 0x2d5   : > { %v670_v43 = vsub.f32 %v667_v42, %v669_v41 }
 0x2d7   : > { %v671_v44 = vmul.f32 0.03125, %v670_v43 }
 0x2d9   : > { %v672_v46 = vadd.f32 1e-05, %v671_v44 }
 0x2db   : > { %1503 = vrsqrt.f32 %v672_v46 }
 0x2e5   : > { %v1504_v51 = vpop.eup %1503 }
 0x2e6   : > { %v674_v53 = vmul.f32 %v1504_v51, %v664_v13  ;;  %v1367_v13 = vpack.c.bf16 (!%p1198_p13), %v918_v10, %v917_v9 }
 0x2e8   : > { %v682_v55 = vmul.f32 %v1194_v27, %v674_v53  ;;  %1368 = vmatpush3.bf16.msra.mxu0 (!%p1198_p13), %v1367_v13 }
 0x2e9   : > { %1369 = vmatprep.subr.bf16.mxu0 (!%p1198_p13), %v1760_v12 }
 0x2ea   : > { %v690_v58 = vadd.f32 %v1195_v54, %v682_v55 }
 0x2ec   : > { %v807_v59 = vmul.f32 %v805_v56, %v690_v58  ;;  %1371 = vmatpush3.bf16.msra.mxu0 (!%p1198_p13), %v1370_v16 }
 0x2ed   : > { %1372 = vmatprep.subr.bf16.mxu0 (!%p1198_p13), %v1760_v12 }
 0x2ee   : > { %v808_v61 = vadd.f32 %v807_v59, %v690_v58 }
 0x2f0   : > { %v809_v62 = vadd.f32 %v808_v61, %v803_v60 }
 0x2f2   : > { %1273 = vmatmul.mubr.f32.vlgmr.msra.gmra.mrb[0].mxu1 %v809_v62 }
 0x3c5   : > { %v899_v0 = vpop.f32.mrb[0].mxu1 }
 0x3c6   : > { %v900_v1 = vadd.f32 %v1196_v63, %v899_v0  ;;  %v1274_v2 = vpop.f32.mrb[1].mxu1 }
 0x3c8   : > { %v1197_v3 = vmul.f32 -1.442695, %v900_v1 }
 0x3ca   : > { %1505 = vpow2.f32 %v1197_v3 }
 0x3d4   : > { %v1506_v4 = vpop.eup %1505 }
 0x3d5   : > { %v906_v5 = vadd.f32 1.0, %v1506_v4 }
 0x3d7   : > { %1507 = vrcp.f32 %v906_v5 }
 0x3e0   : > { %915 = sbr.rel (%p1198_p13) target bundleno = 1236 (0x4d4), region = 92 }
 0x3e1   : > { %v1508_v6 = vpop.eup %1507 }
 0x3e2   : > { %v909_v7 = vmul.f32 %v1508_v6, %v900_v1 }
 0x3e4   : > { %v910_v8 = vadd.f32 %v909_v7, %v2086_v20  ;;  %v1373_v20 = vpack.c.bf16 (!%p1198_p13), %v922_v18, %v921_v17 }
 0x3e6   : > { %911 = vst [vmem:[#allocation2] sm:$0xff] %v910_v8  ;;  %1374 = vmatpush3.bf16.msra.mxu0 (!%p1198_p13), %v1373_v20 }
 0x3e7   : > { %1375 = vmatprep.subr.bf16.mxu0 %v1760_v12 }
 0x3ea   : > { %1377 = vmatpush3.bf16.msra.mxu0 %v1376_v22 }
 0x3eb   : > { %1378 = vmatprep.subr.bf16.mxu0 %v1760_v12 }
 0x3ed   : > { %v916_v36 = vld [vmem:[#allocation2] sm:$0xff] }
 0x3ee   : > { %1380 = vmatpush3.bf16.msra.mxu0 %v1379_v25 }
 0x3ef   : > { %1381 = vmatprep.subr.bf16.mxu0 %v1760_v12 }
 0x3f2   : > { %1383 = vmatpush3.bf16.msra.mxu0 %v1382_v29 }
 0x3f3   : > { %1384 = vmatprep.subr.bf16.mxu0 %v1760_v12 }
 0x3f6   : > { %1386 = vmatpush3.bf16.msra.mxu0 %v1385_v32 }
 0x3f7   : > { %1387 = vmatprep.subr.bf16.mxu0 %v1760_v12 }
 0x3fa   : > { %1389 = vmatpush3.bf16.msra.mxu0 %v1388_v35 }
 0x3fd   : > { %1308 = vmatmul.mubr.f32.vlgmr.msra.gmra.mrb[0].mxu0 %v916_v36 }
 0x4d0   : > { %v1006_v38 = vpop.f32.mrb[0].mxu0 }
 0x4d1   : > { %v1007_v39 = vadd.f32 %v1199_v37, %v1006_v38  ;;  %v1309_v40 = vpop.f32.mrb[1].mxu0 }
 0x4d3   : > { %1010 = vst [vmem:[#allocation12] sm:$0xff] %v1007_v39 }
 0x4d4 PF: > { %p1434_p2 = scmp.eq.s32.totalorder %s1853_s23, 1  ;;  %s1763_s14 = smov [#allocation12]  }
 0x4d5   : > { %s1020_s8 = sshll.u32 %s1763_s14, 4  ;;  %s1021_s8 = int_to_ptr.vmem [resolvable:$true] %s1020_s8 }
 0x4d6   : > { %s1653_s16 = scalar_lea.vmem %s1021_s8, 128  ;;  %p1660_p6 = scmp.lt.s32.totalorder %s1021_s8, %s1021_s8 }
 0x4d7   : > { %p1654_p10 = scmp.ne.s32.totalorder %s1021_s8, %s1653_s16  ;;  %p1661_p8 = scmp.lt.s32.totalorder %s1653_s16, %s1653_s16 }
 0x4d9   : > { %p1655_p3 = pnand %p1654_p10, %p1434_p2  ;;  %p1662_p1 = por %p1661_p8, %p1660_p6 }
 0x4db   : > { %p1656_p9 = pneg %p1655_p3 }
 0x4dd   : > { %p1663_p4 = pnand %p1662_p1, %p1656_p9 }
 0x4df   : > { %1666 = shalt.err (!%p1663_p4)
}
 0x4e0   : > { %s2260_s0 = sld [smem:[#allocation27_spill]] }
 0x4e6   : > { %s1667_s22 = scalar_lea.hbm %s2260_s0, 128 }
 0x4e7   : > { %p1668_p12 = scmp.ne.s32.totalorder %s2260_s0, %s1667_s22  ;;  %p1673_p11 = scmp.lt.u32.totalorder %s1667_s22, %s2260_s0 }
 0x4e9   : > { %p1669_p5 = pnand %p1668_p12, %p1434_p2 }
 0x4eb   : > { %p1670_p7 = pneg %p1669_p5 }
 0x4ed   : > { %p1675_p0 = pnand %p1673_p11, %p1670_p7 }
 0x4ef   : > { %1678 = shalt.err (!%p1675_p0)
}
 0x4f0   : > { %1407 = dma.vmem_to_hbm [thread:$0]  (%p1434_p2), %s1021_s8, 128, %s2260_s0, [#allocation6]  }
 0x4f1   : > { %1720 = dma.done.wait (%p1434_p2), [#allocation6], 128  }
 0x4f2   : > { %1722 = vsyncadd (%p1434_p2), [#allocation6], 4294967168 }
 0x4f3 PF: > { %s2261_s2 = sld [smem:[#allocation18_spill]]  ;;  %s2262_s1 = sld [smem:[#allocation20_spill]] }
 0x4f4   : > { %s2263_s25 = sld [smem:[#allocation19_spill]]  ;;  %s2264_s17 = smov %s1729_s18 }
 0x4f5   : > { %s2265_s18 = smov %s1733_s19  ;;  %s2267_s20 = smov %s1741_s21 }
 0x4f9   : > { %s24_s22 = sadd.s32 1, %s2261_s2   ;;  %s2266_s19 = smov %s2262_s1 }
 0x4fa   : > { %p21_p13 = scmp.ge.s32.totalorder %s24_s22, 4   ;;  %s2268_s21 = smov %s2263_s25 }
 0x4fc   :  { %23 = sbr.rel (!%p21_p13) target bundleno = 13 (0xd), region = 145 }
 0x503   :  { %1033 = vsyncpa [#allocation5], 1 }
 0x504   :  { %1035 = vsyncpa [#allocation5 + $0x1], 1 }
 0x505   :  { %1036 = vsyncpa [#allocation8], 1 }
 0x506   :  { %1037 = vsyncpa [#allocation6], 1 }
 0x507   :  { %1039 = vsyncpa [#allocation6 + $0x1], 1 }

</bundles_post_ra>
